<compile_context>
chip_gen: v6e
topology: v6e:2x2x1
jax: 0.10.0
libtpu: 0.0.40
codegen_flags: <defaults>
</compile_context>

<pallas_src>
import jax
import jax.numpy as jnp
from jax.experimental import pallas as pl
from jax.experimental.pallas import tpu as pltpu

SEQ = 6
DMODEL = 1024
PE_BATCH = 32          # the torch buffer's leading dim; forward requires B <= 32
LANE_SPLIT = 2         # grid steps along the flattened (SEQ*DMODEL) lane axis


def _build_pe() -> jnp.ndarray:
    """Single (1, SEQ*DMODEL) slab, equal to any row pe[b] of the torch buffer."""
    position = jnp.arange(SEQ, dtype=jnp.float32)[:, None]                         # (6, 1)
    div = 10000.0 ** (2.0 * jnp.arange(0, DMODEL, 2, dtype=jnp.float32) / DMODEL)  # (512,)
    pe_2d = jnp.zeros((SEQ, DMODEL), dtype=jnp.float32)
    pe_2d = pe_2d.at[:, 0::2].set(jnp.sin(position / div))
    pe_2d = pe_2d.at[:, 1::2].set(jnp.cos(position / div))
    # Lane-dense flat layout: (1, 6144); 6144 = 48 * 128.
    return pe_2d.reshape(1, SEQ * DMODEL)


def _add_pe_kernel(x_ref, pe_ref, o_ref):
    # x_ref: (B, block), pe_ref: (1, block) -> broadcast add on the VPU.
    o_ref[...] = x_ref[...] + pe_ref[...]


def positional_encoding_forward(x: jnp.ndarray, pe_flat: jnp.ndarray) -> jnp.ndarray:
    """x: (B, 6, 1024) float32 with B <= 32.  Returns x + pe[:B]."""
    B, S, D = x.shape
    assert S == SEQ and D == DMODEL and B <= PE_BATCH
    SD = S * D
    assert SD % (LANE_SPLIT * 128) == 0
    blk = SD // LANE_SPLIT  # 3072 = 24 * 128, lane-dense

    x_flat = x.reshape(B, SD)  # layout plumbing only; last dim multiple of 128

    out_flat = pl.pallas_call(
        _add_pe_kernel,
        out_shape=jax.ShapeDtypeStruct((B, SD), x.dtype),
        grid=(LANE_SPLIT,),
        in_specs=[
            pl.BlockSpec((B, blk), lambda i: (0, i)),   # x, lane-axis blocks
            pl.BlockSpec((1, blk), lambda i: (0, i)),   # pe slab, matching block
        ],
        out_specs=pl.BlockSpec((B, blk), lambda i: (0, i)),
        compiler_params=pltpu.CompilerParams(
            dimension_semantics=("parallel",),          # shard blocks over v7x's 2 TCs
        ),
        cost_estimate=pl.CostEstimate(
            flops=B * SD,
            transcendentals=0,
            bytes_accessed=2 * B * SD * 4 + SD * 4,
        ),
    )(x_flat, pe_flat)

    return out_flat.reshape(B, S, D)


if __name__ == "__main__":
    key = jax.random.PRNGKey(0)
    B = 2  # small batch (< 32), exercises the pe[:B] slicing semantics
    x = jax.random.normal(key, (B, SEQ, DMODEL), dtype=jnp.float32)

    pe_flat = _build_pe()

    # Pure-JAX reference.
    ref = x + pe_flat.reshape(1, SEQ, DMODEL)

    out = positional_encoding_forward(x, pe_flat)
    out = jax.block_until_ready(out)

    assert out.shape == (B, SEQ, DMODEL)
    assert jnp.allclose(out, ref, atol=1e-6), "mismatch vs reference"

    print("KERNEL_OK")
</pallas_src>

<mosaic_0001>
module attributes {stable_mosaic.version = 11 : i64} {
  func.func @_add_pe_kernel(%arg0: i32, %arg1: memref<2x3072xf32, #tpu.memory_space<vmem>>, %arg2: memref<1x3072xf32, #tpu.memory_space<vmem>>, %arg3: memref<2x3072xf32, #tpu.memory_space<vmem>>) attributes {dimension_semantics = [#tpu.dimension_semantics<parallel>], iteration_bounds = array<i64: 2>, scalar_prefetch = 0 : i64, scratch_operands = 0 : i64, tpu.core_type = #tpu.core_type<tc>, window_params = [{transform_indices = @transform_0, window_bounds = array<i64: 2, 3072>}, {transform_indices = @transform_1, window_bounds = array<i64: 1, 3072>}, {transform_indices = @transform_2, window_bounds = array<i64: 2, 3072>}]} {
    %c0 = arith.constant 0 : index
    %c0_0 = arith.constant 0 : index
    %0 = vector.load %arg1[%c0, %c0_0] : memref<2x3072xf32, #tpu.memory_space<vmem>>, vector<2x3072xf32>
    %c0_1 = arith.constant 0 : index
    %c0_2 = arith.constant 0 : index
    %1 = vector.load %arg2[%c0_1, %c0_2] : memref<1x3072xf32, #tpu.memory_space<vmem>>, vector<1x3072xf32>
    %2 = vector.broadcast %1 : vector<1x3072xf32> to vector<2x3072xf32>
    %3 = arith.addf %0, %2 : vector<2x3072xf32>
    %c0_3 = arith.constant 0 : index
    %c0_4 = arith.constant 0 : index
    %4 = vector.load %arg3[%c0_3, %c0_4] : memref<2x3072xf32, #tpu.memory_space<vmem>>, vector<2x3072xf32>
    tpu.vector_store %arg3[%c0_3, %c0_4], %3 {strides = array<i32>} : memref<2x3072xf32, #tpu.memory_space<vmem>>, vector<2x3072xf32>,
    return
  }
  func.func @transform_0(%arg0: i32) -> (i32, i32) {
    %c0_i32 = arith.constant 0 : i32
    %c0_i32_0 = arith.constant 0 : i32
    return %c0_i32, %arg0 : i32, i32
  }
  func.func @transform_1(%arg0: i32) -> (i32, i32) {
    %c0_i32 = arith.constant 0 : i32
    %c0_i32_0 = arith.constant 0 : i32
    return %c0_i32, %arg0 : i32, i32
  }
  func.func @transform_2(%arg0: i32) -> (i32, i32) {
    %c0_i32 = arith.constant 0 : i32
    %c0_i32_0 = arith.constant 0 : i32
    return %c0_i32, %arg0 : i32, i32
  }
}

</mosaic_0001>

<bundles_post_ra>
// kernel: tpu_custom_call.1
= control target key start
LH: loop header
LB: loop body
LE: loop exit
PB: predicated region body
PF: predicated region fallthrough
CT: control target
= control target key end

     0   :  { %7 = vsyncpa [#allocation3], 0  ;;  %s998_s0 = inlined_call_operand.hbm [shape: f32[2,6144], index: 0, kind: input, shape index: {}]   ;;  %s999_s1 = inlined_call_operand.hbm [shape: f32[1,6144], index: 1, kind: input, shape index: {}]   ;;  %s1000_s2 = inlined_call_operand.hbm [shape: f32[2,6144], index: 2, kind: output, shape index: {}]  }
   0x1   :  { %9 = vsyncpa [#allocation3 + $0x1], 0 }
   0x2   :  { %10 = vsyncpa [#allocation6], 0 }
   0x3   :  { %12 = vsyncpa [#allocation6 + $0x1], 0 }
   0x4   :  { %13 = vsyncpa [#allocation4], 0 }
   0x5   :  { %15 = vsyncpa [#allocation4 + $0x1], 0  ;;  %s750_s9 = smov 0   ;;  %s752_s10 = smov 0  }
   0x6   :  { %s754_s11 = smov 0   ;;  %s756_s12 = smov 0  }
   0x7 LB: > { %s771_s13 = sadd.s32 4294967295, %s729_s12   ;;  %s537_s14 = sadd.s32 4294967294, %s729_s12   ;;  %s729_s12 = sphi %s756_s12, %s1018_s12   ;;  %s725_s11 = sphi %s754_s11, %s1017_s11   ;;  %s721_s10 = sphi %s752_s10, %s1016_s10   ;;  %s717_s9 = sphi %s750_s9, %s1015_s9  }
   0x8   : > { %s775_s15 = sadd.s32 1, %s729_s12   ;;  %s28_s16 = sadd.s32 1, %s725_s11 }
   0x9   : > { %s25_s17 = ssub.s32 %s729_s12, %s775_s15  ;;  %p35_p0 = scmp.ne.s32.totalorder %s725_s11, %s721_s10 }
   0xa   : > { %p26_p1 = scmp.eq.s32.totalorder %s25_s17, 0  ;;  %p36_p2 = scmp.eq.s32.totalorder %s729_s12, 0 }
   0xb   : > { %p41_p3 = scmp.ne.s32.totalorder %s721_s10, %s717_s9  ;;  %p42_p4 = scmp.eq.s32.totalorder %s771_s13, 0 }
   0xc   : > { %s787_s18 = scalar_select %p26_p1, %s725_s11, %s28_s16  }
   0xd   : > { %p37_p5 = por %p36_p2, %p35_p0  ;;  %p789_p6 = por %p42_p4, %p41_p3 }
   0xe   : > { %p91_p7 = scmp.eq.s32.totalorder %s771_s13, 1  ;;  %p97_p8 = scmp.eq.s32.totalorder %s537_s14, 1 }
   0xf   : > { %s1003_s19 = scalar_select %p789_p6, 1, 0 }
  0x10   : > { %p570_p10 = scmp.lt.s32.totalorder %s729_s12, 2  ;;  %p796_p11 = por %p91_p7, %p35_p0 }
  0x11   : > { %p800_p12 = por %p97_p8, %p41_p3  ;;  %s805_s22 = sand.u32 1, %s725_s11  }
  0x12   : > { %s1004_s20 = scalar_select %p796_p11, 1, 0 }
  0x13   : > { %s1005_s21 = scalar_select %p800_p12, 1, 0 }
  0x14   : > { %s546_s23 = smul.u32 768, %s729_s12  ;;  %p814_p13 = pnand %p570_p10, %p37_p5 }
  0x15   : > { %s549_s24 = smul.u32 48, %s805_s22  ;;  %s118_s3 = scalar_lea.sflag [#allocation3], %s805_s22 }
  0x16   : > { %s812_s27 = scalar_lea.hbm %s998_s0, %s546_s23  ;;  %p607_p3 = pneg %p814_p13 }
  0x17   : > { %s121_s29 = scalar_lea.vmem [#allocation2], %s549_s24  ;;  %s605_s4 = scalar_lea.hbm %s812_s27, 768 }
  0x18   : > { %s129_s30 = sshll.u32 %s121_s29, 4  ;;  %p606_p2 = scmp.ne.s32.totalorder %s812_s27, %s605_s4  ;;  %s130_s30 = int_to_ptr.vmem [resolvable:$true] %s129_s30 }
  0x19   : > { %s610_s7 = scalar_lea.hbm %s998_s0, 1536  ;;  %p611_p5 = scmp.lt.s32.totalorder %s812_s27, %s998_s0 }
  0x1a   : > { %p608_p4 = pnand %p607_p3, %p606_p2  ;;  %p612_p8 = scmp.lt.s32.totalorder %s610_s7, %s605_s4 }
  0x1c   : > { %p609_p7 = pneg %p608_p4  ;;  %p613_p10 = por %p612_p8, %p611_p5 }
  0x1e   : > { %p614_p9 = pnand %p613_p10, %p609_p7 }
  0x20   : > { %617 = shalt.err (!%p614_p9)
}
  0x21   : > { %s618_s16 = scalar_lea.vmem %s130_s30, 768  ;;  %s731_s17 = smov [#allocation2]  }
  0x22   : > { %p619_p0 = scmp.ne.s32.totalorder %s130_s30, %s618_s16  ;;  %s623_s23 = sshll.u32 %s731_s17, 4  ;;  %s624_s23 = int_to_ptr.vmem [resolvable:$false] %s623_s23 }
  0x23   : > { %s625_s24 = scalar_lea.vmem %s624_s23, 1536  ;;  %p626_p4 = scmp.lt.s32.totalorder %s130_s30, %s624_s23 }
  0x24   : > { %p621_p1 = pnand %p619_p0, %p607_p3  ;;  %p627_p12 = scmp.lt.s32.totalorder %s625_s24, %s618_s16 }
  0x26   : > { %p622_p2 = pneg %p621_p1  ;;  %p628_p11 = por %p627_p12, %p626_p4 }
  0x28   : > { %p629_p6 = pnand %p628_p11, %p622_p2 }
  0x2a   : > { %632 = shalt.err (!%p629_p6)
}
  0x2b   : > { %562 = dma.hbm_to_vmem [thread:$0]  (!%p814_p13), %s812_s27, 768, %s130_s30, %s118_s3  }
  0x2c   : > { %p1007_p9 = scmp.lt.s32.totalorder %s729_s12, 3  ;;  %p1008_p0 = scmp.ge.s32.totalorder %s729_s12, 1 }
  0x2d   : > { %s550_s26 = smul.u32 24, %s805_s22  ;;  %s137_s27 = scalar_lea.sflag [#allocation6], %s805_s22 }
  0x2e   : > { %p845_p1 = pnand %p1008_p0, %p1007_p9  ;;  %s547_s29 = smul.u32 384, %s729_s12 }
  0x2f   : > { %s140_s7 = scalar_lea.vmem [#allocation5], %s550_s26  ;;  %s638_s16 = scalar_lea.hbm %s999_s1, 768 }
  0x30   : > { %s1009_s25 = scalar_select %p845_p1, 1, 0 }
  0x31   : > { %s854_s6 = scalar_lea.hbm %s999_s1, %s547_s29  ;;  %s148_s8 = sshll.u32 %s140_s7, 4  ;;  %s149_s8 = int_to_ptr.vmem [resolvable:$true] %s148_s8 }
  0x32   : > { %s633_s30 = scalar_lea.hbm %s854_s6, 384  ;;  %p639_p7 = scmp.lt.s32.totalorder %s854_s6, %s999_s1 }
  0x33   : > { %p634_p6 = scmp.ne.s32.totalorder %s854_s6, %s633_s30  ;;  %p640_p5 = scmp.lt.s32.totalorder %s638_s16, %s633_s30 }
  0x35   : > { %p636_p11 = pnand %p634_p6, %p607_p3  ;;  %p641_p8 = por %p640_p5, %p639_p7 }
  0x37   : > { %p637_p12 = pneg %p636_p11 }
  0x39   : > { %p642_p10 = pnand %p641_p8, %p637_p12 }
  0x3b   : > { %645 = shalt.err (!%p642_p10)
}
  0x3c   : > { %s646_s24 = scalar_lea.vmem %s149_s8, 384  ;;  %s732_s22 = smov [#allocation5]  }
  0x3d   : > { %p647_p2 = scmp.ne.s32.totalorder %s149_s8, %s646_s24  ;;  %s651_s26 = sshll.u32 %s732_s22, 4  ;;  %s652_s26 = int_to_ptr.vmem [resolvable:$false] %s651_s26 }
  0x3e   : > { %s653_s29 = scalar_lea.vmem %s652_s26, 768  ;;  %p654_p0 = scmp.lt.s32.totalorder %s149_s8, %s652_s26 }
  0x3f   : > { %p649_p4 = pnand %p647_p2, %p607_p3  ;;  %p655_p6 = scmp.lt.s32.totalorder %s653_s29, %s646_s24 }
  0x41   : > { %p650_p9 = pneg %p649_p4  ;;  %p656_p11 = por %p655_p6, %p654_p0 }
  0x43   : > { %p657_p1 = pnand %p656_p11, %p650_p9 }
  0x45   : > { %660 = shalt.err (!%p657_p1)
}
  0x46   : > { %565 = dma.hbm_to_vmem [thread:$0]  (!%p814_p13), %s854_s6, 384, %s149_s8, %s137_s27  }
  0x47   : > { %p1010_p12 = scmp.ne.s32.totalorder %s1009_s25, 0 }
  0x48   : > { %s878_s4 = sand.u32 (!%p1010_p12), 1, %s721_s10   ;;  %p1011_p3 = scmp.ne.s32.totalorder (!%p1010_p12), %s1003_s19, 0 }
  0x49   : > { %157 = sbr.rel (%p1010_p12) target bundleno = 124 (0x7c), region = 28  ;;  %s160_s7 = scalar_lea.sflag (!%p1010_p12), [#allocation3], %s878_s4 }
  0x4a   : > { %s551_s5 = smul.u32 (!%p1010_p12), 48, %s878_s4 }
  0x4c   : > { %s884_s30 = scalar_lea.vmem (!%p1010_p12), [#allocation2], %s551_s5 }
  0x4e   : > { %704 = dma.done.wait (%p1011_p3), %s160_s7, 768  }
  0x4f   : > { %706 = vsyncadd (%p1011_p3), %s160_s7, 4294966528  ;;  %s552_s28 = smul.u32 24, %s878_s4  ;;  %s169_s25 = scalar_lea.sflag [#allocation6], %s878_s4 }
  0x51   : > { %s892_s6 = scalar_lea.vmem [#allocation5], %s552_s28 }
  0x52   : > { %708 = dma.done.wait (%p1011_p3), %s169_s25, 384  }
  0x53   : > { %710 = vsyncadd (%p1011_p3), %s169_s25, 4294966912  ;;  %v213_v0 = vlaneseq  ;;  %v733_v1 = vmov 1983009808   ;;  %v207_v13 = vld [vmem:[%s892_s6] sm:$0xff]  ;;  %v208_v19 = vld [vmem:[%s892_s6 + $0x8] sm:$0xff]  ;;  %s936_s19 = scalar_lea.vmem [#allocation7], %s551_s5 }
  0x54   : > { %v312_v2 = vunpack.c.l.s4 %v733_v1  ;;  %v209_v36 = vld [vmem:[%s892_s6 + $0x10] sm:$0xff]  ;;  %v201_v37 = vld [vmem:[%s884_s30] sm:$0xff]  ;;  %v202_v43 = vld [vmem:[%s884_s30 + $0x8] sm:$0xff]  ;;  %s548_s8 = smul.u32 768, %s771_s13  ;;  %s444_s27 = sshll.u32 %s936_s19, 4  ;;  %s956_s27 = int_to_ptr.vmem [resolvable:$true] %s444_s27 }
  0x55   : > { %v214_v3 = vshrl.u32 %v213_v0, 7  ;;  %v203_v52 = vld [vmem:[%s884_s30 + $0x10] sm:$0xff]  ;;  %v204_v1 = vld [vmem:[%s884_s30 + $0x18] sm:$0xff]  ;;  %s430_s17 = scalar_lea.sflag [#allocation4], %s878_s4  ;;  %s661_s23 = scalar_lea.vmem %s956_s27, 768 }
  0x56   : > { %v313_v4 = vunpack.c.0.s8 %v312_v2  ;;  %s442_s16 = scalar_lea.hbm %s1000_s2, %s548_s8  ;;  %p662_p13 = scmp.ne.s32.totalorder %s956_s27, %s661_s23 }
  0x57   : > { %v215_v5 = vsub.s32 0, %v214_v3  ;;  %v219_v6 = vsub.s32 1, %v214_v3  ;;  %v898_v7 = vsub.s32 2, %v214_v3  ;;  %v227_v8 = vsub.s32 3, %v214_v3  ;;  %p1012_p1 = scmp.ne.s32.totalorder %s1004_s20, 0  ;;  %s734_s13 = smov [#allocation7]  }
  0x58   : > { %v900_v9 = vsub.s32 4, %v214_v3  ;;  %v902_v10 = vsub.s32 5, %v214_v3  ;;  %v904_v11 = vsub.s32 6, %v214_v3  ;;  %v906_v12 = vsub.s32 7, %v214_v3  ;;  %s665_s24 = sshll.u32 %s734_s13, 4  ;;  %s666_s24 = int_to_ptr.vmem [resolvable:$false] %s665_s24 }
  0x59   : > { %v909_v14 = vsub.s32 %v313_v4, %v214_v3  ;;  %v216_v15 = vrot.slane %v207_v13, %v215_v5  ;;  %v220_v16 = vrot.slane %v207_v13, %v219_v6  ;;  %v224_v17 = vrot.slane %v207_v13, %v898_v7  ;;  %p663_p7 = pnand %p662_p13, %p1012_p1  ;;  %s667_s22 = scalar_lea.vmem %s666_s24, 1536 }
  0x5a   : > { %v228_v18 = vrot.slane %v207_v13, %v227_v8  ;;  %v232_v20 = vrot.slane %v207_v13, %v900_v9  ;;  %v236_v21 = vrot.slane %v207_v13, %v902_v10  ;;  %v240_v22 = vrot.slane %v207_v13, %v904_v11  ;;  %p668_p8 = scmp.lt.s32.totalorder %s956_s27, %s666_s24  ;;  %p669_p10 = scmp.lt.s32.totalorder %s667_s22, %s661_s23 }
  0x5b   : > { %v244_v23 = vrot.slane %v207_v13, %v906_v12  ;;  %v309_v24 = vcombine.low %v216_v15, %v220_v16  ;;  %v248_v26 = vrot.slane %v208_v19, %v215_v5  ;;  %v252_v27 = vrot.slane %v208_v19, %v219_v6  ;;  %v205_v13 = vld [vmem:[%s884_s30 + $0x20] sm:$0xff]  ;;  %p664_p5 = pneg %p663_p7 }
  0x5c   : > { %v310_v25 = vcombine.low %v224_v17, %v228_v18  ;;  %v326_v28 = vcombine.low %v232_v20, %v236_v21  ;;  %v256_v30 = vrot.slane %v208_v19, %v898_v7  ;;  %v260_v31 = vrot.slane %v208_v19, %v227_v8  ;;  %p670_p2 = por %p669_p10, %p668_p8 }
  0x5d   : > { %v327_v29 = vcombine.low %v240_v22, %v244_v23  ;;  %v317_v32 = vrot.slane %v309_v24, %v909_v14  ;;  %v343_v34 = vcombine.low %v248_v26, %v252_v27  ;;  %v264_v35 = vrot.slane %v208_v19, %v900_v9 }
  0x5e   : > { %v324_v33 = vrot.slane %v310_v25, %v909_v14  ;;  %v334_v38 = vrot.slane %v326_v28, %v909_v14  ;;  %v344_v40 = vcombine.low %v256_v30, %v260_v31  ;;  %v268_v41 = vrot.slane %v208_v19, %v902_v10  ;;  %p671_p4 = pnand %p670_p2, %p664_p5 }
  0x5f   : > { %v341_v39 = vrot.slane %v327_v29, %v909_v14  ;;  %v351_v44 = vrot.slane %v343_v34, %v909_v14  ;;  %v272_v45 = vrot.slane %v208_v19, %v904_v11  ;;  %v276_v46 = vrot.slane %v208_v19, %v906_v12 }
  0x60   : > { %v325_v42 = vcombine.low %v317_v32, %v324_v33  ;;  %v358_v48 = vrot.slane %v344_v40, %v909_v14  ;;  %v360_v49 = vcombine.low %v264_v35, %v268_v41  ;;  %v280_v50 = vrot.slane %v209_v36, %v215_v5 }
  0x61   : > { %v342_v47 = vcombine.low %v334_v38, %v341_v39  ;;  %v361_v53 = vcombine.low %v272_v45, %v276_v46  ;;  %v284_v54 = vrot.slane %v209_v36, %v219_v6  ;;  %v288_v55 = vrot.slane %v209_v36, %v898_v7 }
  0x62   : > { %v417_v51 = vadd.f32 %v325_v42, %v201_v37  ;;  %v359_v57 = vcombine.low %v351_v44, %v358_v48  ;;  %v368_v58 = vrot.slane %v360_v49, %v909_v14  ;;  %v292_v59 = vrot.slane %v209_v36, %v227_v8 }
  0x63   : > { %v418_v56 = vadd.f32 %v342_v47, %v202_v43  ;;  %v375_v60 = vrot.slane %v361_v53, %v909_v14  ;;  %v377_v61 = vcombine.low %v280_v50, %v284_v54  ;;  %v296_v62 = vrot.slane %v209_v36, %v900_v9 }
  0x64   : > { %423 = vst [vmem:[%s936_s19] sm:$0xff] %v417_v51  ;;  %v300_v63 = vrot.slane %v209_v36, %v902_v10  ;;  %v419_v0 = vadd.f32 %v359_v57, %v203_v52  ;;  %v378_v2 = vcombine.low %v288_v55, %v292_v59  ;;  %v304_v3 = vrot.slane %v209_v36, %v904_v11 }
  0x65   : > { %424 = vst [vmem:[%s936_s19 + $0x8] sm:$0xff] %v418_v56  ;;  %v308_v4 = vrot.slane %v209_v36, %v906_v12  ;;  %v376_v5 = vcombine.low %v368_v58, %v375_v60  ;;  %v385_v6 = vrot.slane %v377_v61, %v909_v14  ;;  %v206_v12 = vld [vmem:[%s884_s30 + $0x28] sm:$0xff] }
  0x66   : > { %v394_v7 = vcombine.low %v296_v62, %v300_v63  ;;  %425 = vst [vmem:[%s936_s19 + $0x10] sm:$0xff] %v419_v0  ;;  %v392_v8 = vrot.slane %v378_v2, %v909_v14 }
  0x67   : > { %v395_v9 = vcombine.low %v304_v3, %v308_v4  ;;  %v420_v10 = vadd.f32 %v376_v5, %v204_v1 }
  0x68   : > { %v402_v15 = vrot.slane %v394_v7, %v909_v14  ;;  %v393_v16 = vcombine.low %v385_v6, %v392_v8 }
  0x69   : > { %v409_v11 = vrot.slane %v395_v9, %v909_v14  ;;  %426 = vst [vmem:[%s936_s19 + $0x18] sm:$0xff] %v420_v10 }
  0x6a   : > { %v421_v17 = vadd.f32 %v393_v16, %v205_v13 }
  0x6b   : > { %v410_v18 = vcombine.low %v402_v15, %v409_v11 }
  0x6c   : > { %427 = vst [vmem:[%s936_s19 + $0x20] sm:$0xff] %v421_v17 }
  0x6d   : > { %v422_v19 = vadd.f32 %v410_v18, %v206_v12 }
  0x6f   : > { %428 = vst [vmem:[%s936_s19 + $0x28] sm:$0xff] %v422_v19 }
  0x70   : > { %674 = shalt.err (!%p671_p4)
}
  0x71   : > { %s675_s26 = scalar_lea.hbm %s442_s16, 768  ;;  %s679_s5 = scalar_lea.hbm %s1000_s2, 1536 }
  0x72   : > { %p676_p9 = scmp.ne.s32.totalorder %s442_s16, %s675_s26  ;;  %p680_p11 = scmp.lt.s32.totalorder %s442_s16, %s1000_s2 }
  0x73   : > { %p681_p12 = scmp.lt.s32.totalorder %s679_s5, %s675_s26 }
  0x74   : > { %p677_p0 = pnand %p676_p9, %p1012_p1 }
  0x75   : > { %p682_p3 = por %p681_p12, %p680_p11 }
  0x76   : > { %p678_p6 = pneg %p677_p0 }
  0x78   : > { %p683_p13 = pnand %p682_p3, %p678_p6 }
  0x7a   : > { %686 = shalt.err (!%p683_p13)
}
  0x7b   : > { %557 = dma.vmem_to_hbm [thread:$0]  (%p1012_p1), %s956_s27, 768, %s442_s16, %s430_s17  }
  0x7c PF: > { %s456_s28 = sand.u32 1, %s717_s9   ;;  %p1013_p7 = scmp.ne.s32.totalorder %s1005_s21, 0 }
  0x7d   : > { %p1014_p5 = scmp.ge.s32.totalorder %s729_s12, 2  ;;  %s457_s25 = scalar_lea.sflag [#allocation4], %s456_s28 }
  0x7f   : > { %p567_p8 = pnand %p1014_p5, %p1013_p7 }
  0x81   : > { %p568_p10 = pneg %p567_p8 }
  0x83   : > { %712 = dma.done.wait (%p568_p10), %s457_s25, 768  }
  0x84   : > { %714 = vsyncadd (%p568_p10), %s457_s25, 4294966528  ;;  %p18_p2 = scmp.ge.s32.totalorder %s775_s15, 4   ;;  %s1015_s9 = smov %s721_s10 }
  0x85   : > { %s1016_s10 = smov %s725_s11  ;;  %s1017_s11 = smov %s787_s18 }
  0x86   : > { %s1018_s12 = smov %s775_s15  ;;  %20 = sbr.rel (!%p18_p2) target bundleno = 7 (0x7), region = 86 }
  0x8b   :  { %462 = vsyncpa [#allocation3], 1 }
  0x8c   :  { %464 = vsyncpa [#allocation3 + $0x1], 1 }
  0x8d   :  { %465 = vsyncpa [#allocation6], 1 }
  0x8e   :  { %467 = vsyncpa [#allocation6 + $0x1], 1 }
  0x8f   :  { %468 = vsyncpa [#allocation4], 1 }
  0x90   :  { %470 = vsyncpa [#allocation4 + $0x1], 1 }

</bundles_post_ra>
